<compile_context>
chip_gen: v5e
topology: v5e:2x2
jax: 0.10.0
libtpu: 0.0.40
codegen_flags: <defaults>
</compile_context>

<pallas_src>
import math

import jax
import jax.numpy as jnp
from jax.experimental import pallas as pl
from jax.experimental.pallas import tpu as pltpu


# ----------------------------- Pallas kernel --------------------------------
def pe_add_kernel(x_ref, pe_ref, out_ref):
    # x_ref:  (bb, Ft)  batch-block x feature-tile of flattened sequences
    # pe_ref: (1,  Ft)  flattened positional-encoding tile (broadcast over bb)
    # TODO(synk): nn.Dropout is identity at inference; training-mode dropout
    # would add a pltpu.prng_seed / pltpu.prng_random_bits mask + 1/(1-p) scale.
    out_ref[...] = x_ref[...] + pe_ref[...]


# ------------------------------ helpers --------------------------------------
def _round_up(n: int, m: int) -> int:
    return ((n + m - 1) // m) * m


def make_positional_encoding(d_model: int, seq_len: int, dtype=jnp.float32):
    """Builds the pe buffer exactly as the module __init__ does (once, in dtype)."""
    position = jnp.arange(seq_len, dtype=jnp.float32)[:, None]            # (S, 1)
    div_term = jnp.exp(
        jnp.arange(0, d_model, 2, dtype=jnp.float32) * (-math.log(10000.0) / d_model)
    )                                                                      # (D/2,)
    pe = jnp.zeros((seq_len, d_model), jnp.float32)
    pe = pe.at[:, 0::2].set(jnp.sin(position * div_term))
    pe = pe.at[:, 1::2].set(jnp.cos(position * div_term))
    return pe.astype(dtype)                                                # cast once


# ------------------------------ wrapper --------------------------------------
def positional_encoding_forward(x, pe, *, donate_x: bool = False):
    """x: (B, T, D);  pe: (seq_len, D) buffer with seq_len >= T."""
    B, T, D = x.shape
    assert pe.shape[0] >= T and pe.shape[1] == D, "pe buffer too small for input"
    dtype = x.dtype
    itemsize = jnp.dtype(dtype).itemsize

    LANE = 128
    sub = max(8, 32 // itemsize)        # dtype-aware sublane multiple: 8/16/32

    # ---- lane-dense flattened layout -----------------------------------------
    F = T * D
    F128 = _round_up(F, LANE)
    xf = x.reshape(B, F)
    pef = pe[:T].astype(dtype).reshape(1, F)     # no-op cast if pe built in dtype

    # ---- block sizing against an explicit scoped-VMEM budget -----------------
    VMEM_LIMIT = 32 * 1024 * 1024                # raise v5e default; = v6e/v7x default
    pipeline_budget = (3 * VMEM_LIMIT) // 4      # leave headroom for compiler scratch
    block_budget = pipeline_budget // 5          # x & out double-buffered (4x) + pe
    max_block_elems = block_budget // itemsize

    if sub * F128 <= max_block_elems:
        Ft = F128                                               # whole row fits
        max_rows = max(sub, ((max_block_elems // F128) // sub) * sub)
    else:
        Ft = max(LANE, ((max_block_elems // sub) // LANE) * LANE)  # tile the lane axis
        max_rows = sub

    # Pad lane axis so every store is a full, unmasked 128-lane vst.
    Fp = _round_up(F, Ft)
    if Fp != F:
        xf = jnp.pad(xf, ((0, 0), (0, Fp - F)))
        pef = jnp.pad(pef, ((0, 0), (0, Fp - F)))

    # Batch block: sublane multiple, within budget, and capped at ~ceil(B/2) so
    # large batches give >= 2 grid steps for v7x megacore sharding.
    megacore_cap = _round_up(pl.cdiv(B, 2), sub)
    bb_limit = max(sub, min(max_rows, megacore_cap))
    bb = sub
    while bb * 2 <= bb_limit:
        bb *= 2

    Bp = _round_up(B, bb)
    if Bp != B:
        xf = jnp.pad(xf, ((0, Bp - B), (0, 0)))  # padded rows sliced off below

    nb, nf = Bp // bb, Fp // Ft

    extra = {}
    if donate_x:
        # Write the result into x's HBM buffer (use inside jit graphs where x is
        # dead afterwards; off by default so callers keep x intact).
        extra["input_output_aliases"] = {0: 0}

    out_flat = pl.pallas_call(
        pe_add_kernel,
        out_shape=jax.ShapeDtypeStruct((Bp, Fp), dtype),
        grid=(nb, nf),
        in_specs=[
            pl.BlockSpec((bb, Ft), lambda b, f: (b, f)),   # x batch/feature block
            pl.BlockSpec((1, Ft), lambda b, f: (0, f)),    # pe tile (broadcast over bb)
        ],
        out_specs=pl.BlockSpec((bb, Ft), lambda b, f: (b, f)),
        compiler_params=pltpu.CompilerParams(
            dimension_semantics=("parallel", "parallel"),  # independent blocks
            vmem_limit_bytes=VMEM_LIMIT,
        ),
        cost_estimate=pl.CostEstimate(
            flops=Bp * Fp,
            transcendentals=0,
            bytes_accessed=(2 * Bp * Fp + Fp) * itemsize,
        ),
        **extra,
    )(xf, pef)

    return out_flat[:B, :F].reshape(B, T, D)


# --------------------------------- main ---------------------------------------
if __name__ == "__main__":
    key = jax.random.PRNGKey(0)

    # Small shapes consistent with the module: d_model=32, pe buffer seq_len=16,
    # input sequence length T=8 (< seq_len, exercises the pe[:, :T, :] slice).
    B, T, D_MODEL, SEQ_LEN, DROPOUT = 2, 8, 32, 16, 0.1

    x = jax.random.normal(key, (B, T, D_MODEL), jnp.float32)
    pe = make_positional_encoding(D_MODEL, SEQ_LEN, dtype=x.dtype)

    # Pure-JAX reference (dropout is identity in eval mode).
    ref = x + pe[None, :T, :]

    out = positional_encoding_forward(x, pe)
    out = jax.block_until_ready(out)

    assert out.shape == (B, T, D_MODEL)
    err = float(jnp.max(jnp.abs(out - ref)))
    if not bool(jnp.isfinite(out).all()) or err > 1e-6:
        raise RuntimeError(f"kernel/reference mismatch: max abs err {err}")
    print("KERNEL_OK")
</pallas_src>

<mosaic_0001>
module attributes {stable_mosaic.version = 11 : i64} {
  func.func @pe_add_kernel(%arg0: i32, %arg1: i32, %arg2: memref<8x256xf32, #tpu.memory_space<vmem>>, %arg3: memref<1x256xf32, #tpu.memory_space<vmem>>, %arg4: memref<8x256xf32, #tpu.memory_space<vmem>>) attributes {dimension_semantics = [#tpu.dimension_semantics<parallel>, #tpu.dimension_semantics<parallel>], iteration_bounds = array<i64: 1, 1>, scalar_prefetch = 0 : i64, scratch_operands = 0 : i64, tpu.core_type = #tpu.core_type<tc>, window_params = [{transform_indices = @transform_0, window_bounds = array<i64: 8, 256>}, {transform_indices = @transform_1, window_bounds = array<i64: 1, 256>}, {transform_indices = @transform_2, window_bounds = array<i64: 8, 256>}]} {
    %c0 = arith.constant 0 : index
    %c0_0 = arith.constant 0 : index
    %0 = vector.load %arg2[%c0, %c0_0] : memref<8x256xf32, #tpu.memory_space<vmem>>, vector<8x256xf32>
    %c0_1 = arith.constant 0 : index
    %c0_2 = arith.constant 0 : index
    %1 = vector.load %arg3[%c0_1, %c0_2] : memref<1x256xf32, #tpu.memory_space<vmem>>, vector<1x256xf32>
    %2 = vector.broadcast %1 : vector<1x256xf32> to vector<8x256xf32>
    %3 = arith.addf %0, %2 : vector<8x256xf32>
    %c0_3 = arith.constant 0 : index
    %c0_4 = arith.constant 0 : index
    %4 = vector.load %arg4[%c0_3, %c0_4] : memref<8x256xf32, #tpu.memory_space<vmem>>, vector<8x256xf32>
    tpu.vector_store %arg4[%c0_3, %c0_4], %3 {strides = array<i32>} : memref<8x256xf32, #tpu.memory_space<vmem>>, vector<8x256xf32>,
    return
  }
  func.func @transform_0(%arg0: i32, %arg1: i32) -> (i32, i32) {
    %c0_i32 = arith.constant 0 : i32
    return %arg0, %arg1 : i32, i32
  }
  func.func @transform_1(%arg0: i32, %arg1: i32) -> (i32, i32) {
    %c0_i32 = arith.constant 0 : i32
    %c0_i32_0 = arith.constant 0 : i32
    return %c0_i32, %arg1 : i32, i32
  }
  func.func @transform_2(%arg0: i32, %arg1: i32) -> (i32, i32) {
    %c0_i32 = arith.constant 0 : i32
    return %arg0, %arg1 : i32, i32
  }
}

</mosaic_0001>

<bundles_post_ra>
// kernel: tpu_custom_call.1
= control target key start
LH: loop header
LB: loop body
LE: loop exit
PB: predicated region body
PF: predicated region fallthrough
CT: control target
= control target key end

     0   :  { %7 = vsyncpa [#allocation3], 0  ;;  %s178_s0 = inlined_call_operand.hbm [shape: f32[8,256], index: 0, kind: input, shape index: {}]   ;;  %s179_s1 = inlined_call_operand.hbm [shape: f32[1,256], index: 1, kind: input, shape index: {}]   ;;  %s180_s2 = inlined_call_operand.hbm [shape: f32[8,256], index: 2, kind: output, shape index: {}]  }
   0x1   :  { %8 = vsyncpa [#allocation6], 0 }
   0x2   :  { %9 = vsyncpa [#allocation4], 0  ;;  %s15_s11 = sshll.u32 %s178_s0, 4  ;;  %s151_s12 = smov [#allocation2]   ;;  %s16_s11 = int_to_ptr.hbm [resolvable:$true] %s15_s11 }
   0x3   :  { %s17_s13 = sshll.u32 %s151_s12, 4  ;;  %s26_s16 = sshll.u32 %s179_s1, 4  ;;  %s18_s13 = int_to_ptr.vmem [resolvable:$true] %s17_s13  ;;  %s27_s16 = int_to_ptr.hbm [resolvable:$true] %s26_s16 }
   0x4   :  { %20 = dma.hbm_to_vmem [thread:$0]  %s16_s11, 256, %s18_s13, [#allocation3]  }
   0x5   :  { %s152_s17 = smov [#allocation5]  }
   0x6   :  { %s28_s18 = sshll.u32 %s152_s17, 4  ;;  %s29_s18 = int_to_ptr.vmem [resolvable:$true] %s28_s18 }
   0x7   :  { %31 = dma.hbm_to_vmem [thread:$0]  %s27_s16, 32, %s29_s18, [#allocation6]  }
   0x8   :  { %145 = dma.done.wait [#allocation3], 256  }
   0x9   :  { %146 = vsyncadd [#allocation3], 4294967040 }
   0xa   :  { %147 = dma.done.wait [#allocation6], 32  }
   0xb   :  { %148 = vsyncadd [#allocation6], 4294967264  ;;  %v40_v0 = vld [vmem:[#allocation2] sm:$0xff]  ;;  %v42_v1 = vld [vmem:[#allocation5] sm:$0x3]  ;;  %s153_s0 = smov [#allocation7]  }
   0xc   :  { %v41_v2 = vld [vmem:[#allocation2 + $0x8] sm:$0xff]  ;;  %v44_v3 = vperm.slane %v42_v1, 0  ;;  %v45_v4 = vperm.slane %v42_v1, 1  ;;  %s57_s19 = sshll.u32 %s153_s0, 4  ;;  %s59_s1 = sshll.u32 %s180_s2, 4  ;;  %s58_s19 = int_to_ptr.vmem [resolvable:$true] %s57_s19  ;;  %s60_s1 = int_to_ptr.hbm [resolvable:$true] %s59_s1 }
   0xe   :  { %v48_v5 = vadd.f32 %v44_v3, %v40_v0  ;;  %v49_v6 = vadd.f32 %v45_v4, %v41_v2 }
  0x10   :  { %50 = vst [vmem:[#allocation7] sm:$0xff] %v48_v5 }
  0x11   :  { %51 = vst [vmem:[#allocation7 + $0x8] sm:$0xff] %v49_v6 }
  0x12   :  { %62 = dma.vmem_to_hbm [thread:$0]  %s58_s19, 256, %s60_s1, [#allocation4]  }
  0x13   :  { %149 = dma.done.wait [#allocation4], 256  }
  0x14   :  { %150 = vsyncadd [#allocation4], 4294967040 }
  0x15   :  { %67 = vsyncpa [#allocation3], 1 }
  0x16   :  { %68 = vsyncpa [#allocation6], 1 }
  0x17   :  { %69 = vsyncpa [#allocation4], 1 }

</bundles_post_ra>
